<compile_context>
chip_gen: v7x
topology: tpu7x:2x2x1
jax: 0.10.0
libtpu: 0.0.40
codegen_flags: <defaults>
</compile_context>

<pallas_src>
import functools

import jax
import jax.numpy as jnp
from jax.experimental import pallas as pl
from jax.experimental.pallas import tpu as pltpu


# ------------------------------ kernel --------------------------------------


def _fused_mlp_kernel(num_hidden_layers, num_groups, *refs):
    """refs = [x, (w0, b0, wh, bh, wo) * num_groups, bo, out].

    x  : [tB, 2D]     input tile (first_half | second_half), any float dtype
    w0 : [2D, Gw]     bf16 first-layer weights of this lane group (in, out)
    b0 : [1, Gw]      f32
    wh : [L, Gw, Gw]  bf16 block-diagonal hidden weights (in, out)
    bh : [L, 1, Gw]   f32
    wo : [Gw, 128]    bf16 output weights (col 0 = g, cols 1..D = h_i)
    bo : [1, 128]     f32
    out: [tB, 128]    f32 lane-dense output slab
    """
    x_ref = refs[0]
    bo_ref = refs[1 + 5 * num_groups]
    o_ref = refs[2 + 5 * num_groups]

    xb = x_ref[...].astype(jnp.bfloat16)          # bf16 MXU operand
    acc = bo_ref[...]                             # (1, 128) f32, broadcasts

    for grp in range(num_groups):                 # static unroll (<= 2 groups)
        w0_ref, b0_ref, wh_ref, bh_ref, wo_ref = refs[1 + 5 * grp: 6 + 5 * grp]
        h = jnp.dot(xb, w0_ref[...], preferred_element_type=jnp.float32)
        h = jnp.maximum(h + b0_ref[...], 0.0)     # bias/ReLU in f32
        for l in range(num_hidden_layers):        # static unroll, L is small
            h = jnp.dot(h.astype(jnp.bfloat16), wh_ref[l],
                        preferred_element_type=jnp.float32)
            h = jnp.maximum(h + bh_ref[l], 0.0)
        acc = acc + jnp.dot(h.astype(jnp.bfloat16), wo_ref[...],
                            preferred_element_type=jnp.float32)

    o_ref[...] = acc


# ------------------------------ weight packing (one-time) -------------------


def pack_params(g, h, input_dim, hidden_dim, num_hidden_layers, out_w=128):
    """Pack PyTorch-layout params of model_g + models_h into block-diagonal
    (in, out) bf16 matrices, split into lane-aligned groups of <= 128 columns
    (group boundaries fall on H-wide block boundaries, so cross-group weights
    are exactly zero and the split is lossless).  Called once."""
    D, H, L = input_dim, hidden_dim, num_hidden_layers
    n_blocks = D + 1                       # block 0 = g, block 1+i = h_i
    assert n_blocks < out_w

    blocks_per_group = max(1, 128 // H)    # keep each group <= 128 lanes
    group_layout = []                      # (first_block, n_blocks_in_group)
    b = 0
    while b < n_blocks:
        n = min(blocks_per_group, n_blocks - b)
        group_layout.append((b, n))
        b += n

    Lp = max(L, 1)
    groups = []
    for first_blk, nb in group_layout:
        Gw = nb * H
        w0 = jnp.zeros((2 * D, Gw), jnp.float32)
        b0 = jnp.zeros((1, Gw), jnp.float32)
        wh = jnp.zeros((Lp, Gw, Gw), jnp.float32)
        bh = jnp.zeros((Lp, 1, Gw), jnp.float32)
        wo = jnp.zeros((Gw, out_w), jnp.float32)
        for j in range(nb):
            blk = first_blk + j            # global block index
            s = j * H                      # column offset inside this group
            if blk == 0:                   # ---- model_g (uses first_half) ----
                w0 = w0.at[:D, s:s + H].set(g['w0'].T)
                b0 = b0.at[0, s:s + H].set(g['b0'])
                for l in range(L):
                    wh = wh.at[l, s:s + H, s:s + H].set(g['wh'][l].T)
                    bh = bh.at[l, 0, s:s + H].set(g['bh'][l])
                wo = wo.at[s:s + H, 0].set(g['wo'][0])
            else:                          # ---- models_h[i] (uses x[:, D+i]) --
                i = blk - 1
                w0 = w0.at[D + i, s:s + H].set(h['w0'][i, :, 0])
                b0 = b0.at[0, s:s + H].set(h['b0'][i])
                for l in range(L):
                    wh = wh.at[l, s:s + H, s:s + H].set(h['wh'][i, l].T)
                    bh = bh.at[l, 0, s:s + H].set(h['bh'][i, l])
                wo = wo.at[s:s + H, 1 + i].set(h['wo'][i, 0])
        groups.append(dict(
            w0=w0.astype(jnp.bfloat16), b0=b0,
            wh=wh.astype(jnp.bfloat16), bh=bh,
            wo=wo.astype(jnp.bfloat16)))

    bo = jnp.zeros((1, out_w), jnp.float32)
    bo = bo.at[0, 0].set(g['bo'][0])
    bo = bo.at[0, 1:1 + D].set(h['bo'][:, 0])
    return dict(groups=groups, bo=bo)


# ------------------------------ forward -------------------------------------


def parallel_risk_forward(x, packed, *, input_dim, num_hidden_layers,
                          tile_b=2048):
    """Fused forward.  Batch-tiled grid; weights resident in VMEM."""
    D, L = input_dim, num_hidden_layers
    groups = packed['groups']
    bo = packed['bo']
    OUT_W = bo.shape[1]
    B = x.shape[0]

    # Batch padding / tiling: multiple of 8 sublanes, and (when the batch
    # allows it) at least 2 grid steps so v7x megacore sharding engages.
    b8 = ((B + 7) // 8) * 8
    tile = min(tile_b, b8)
    if b8 >= 16:
        half = (((b8 + 1) // 2 + 7) // 8) * 8
        tile = min(tile, half)
    b_pad = ((b8 + tile - 1) // tile) * tile
    if b_pad != B:
        x = jnp.pad(x, ((0, b_pad - B), (0, 0)))

    flat_inputs = [x]
    in_specs = [pl.BlockSpec((tile, 2 * D), lambda i: (i, 0))]   # x streams
    for grp in groups:                                           # weights stay
        Gw = grp['w0'].shape[1]
        Lp = grp['wh'].shape[0]
        flat_inputs += [grp['w0'], grp['b0'], grp['wh'], grp['bh'], grp['wo']]
        in_specs += [
            pl.BlockSpec((2 * D, Gw), lambda i: (0, 0)),
            pl.BlockSpec((1, Gw), lambda i: (0, 0)),
            pl.BlockSpec((Lp, Gw, Gw), lambda i: (0, 0, 0)),
            pl.BlockSpec((Lp, 1, Gw), lambda i: (0, 0, 0)),
            pl.BlockSpec((Gw, OUT_W), lambda i: (0, 0)),
        ]
    flat_inputs.append(bo)
    in_specs.append(pl.BlockSpec((1, OUT_W), lambda i: (0, 0)))

    slab = pl.pallas_call(
        functools.partial(_fused_mlp_kernel, L, len(groups)),
        out_shape=jax.ShapeDtypeStruct((b_pad, OUT_W), jnp.float32),
        grid=(b_pad // tile,),
        in_specs=in_specs,
        out_specs=pl.BlockSpec((tile, OUT_W), lambda i: (i, 0)),
        compiler_params=pltpu.CompilerParams(
            dimension_semantics=("parallel",),
            vmem_limit_bytes=32 * 1024 * 1024),   # clears v5e's 16 MiB default
    )(*flat_inputs)

    # Lane-dense slab -> module outputs (dict contract of the PyTorch module).
    return {'h': slab[:B, 1:1 + D], 'g': slab[:B, 0:1]}


# ------------------------------ params / reference ---------------------------


def make_params(key, input_dim, hidden_dim, num_hidden_layers):
    """Deterministic init mimicking torch.nn.Linear default (uniform +-1/sqrt(fan_in)).
    Weights stored in PyTorch layout: (out_features, in_features)."""
    D, H, L = input_dim, hidden_dim, num_hidden_layers
    keys = jax.random.split(key, 12)

    def u(k, fan_in, shape):
        b = 1.0 / (fan_in ** 0.5)
        return jax.random.uniform(k, shape, jnp.float32, -b, b)

    g = dict(
        w0=u(keys[0], D, (H, D)), b0=u(keys[1], D, (H,)),
        wh=u(keys[2], H, (L, H, H)), bh=u(keys[3], H, (L, H)),
        wo=u(keys[4], H, (1, H)), bo=u(keys[5], H, (1,)),
    )
    h = dict(
        w0=u(keys[6], 1, (D, H, 1)), b0=u(keys[7], 1, (D, H)),
        wh=u(keys[8], H, (D, L, H, H)), bh=u(keys[9], H, (D, L, H)),
        wo=u(keys[10], H, (D, 1, H)), bo=u(keys[11], H, (D, 1)),
    )
    return g, h


def reference_forward(x, g, h, input_dim, num_hidden_layers):
    D, L = input_dim, num_hidden_layers
    x = x.astype(jnp.float32)
    x1, x2 = x[:, :D], x[:, D:]

    def mlp(inp, w0, b0, wh, bh, wo, bo):
        a = jnp.maximum(inp @ w0.T + b0, 0.0)
        for l in range(L):
            a = jnp.maximum(a @ wh[l].T + bh[l], 0.0)
        return a @ wo.T + bo

    out_g = mlp(x1, g['w0'], g['b0'], g['wh'], g['bh'], g['wo'], g['bo'])
    cols = [mlp(x2[:, i:i + 1], h['w0'][i], h['b0'][i], h['wh'][i],
                h['bh'][i], h['wo'][i], h['bo'][i]) for i in range(D)]
    return {'h': jnp.concatenate(cols, axis=1), 'g': out_g}


# ------------------------------ main ----------------------------------------


if __name__ == "__main__":
    input_dim = 4
    hidden_dim = 32
    num_hidden_layers = 2
    batch = 2

    key = jax.random.PRNGKey(0)
    kx, kp = jax.random.split(key)
    # forward expects x of width 2*input_dim (first half -> g, second half -> h's)
    x = jax.random.normal(kx, (batch, 2 * input_dim), dtype=jnp.float32)
    g_params, h_params = make_params(kp, input_dim, hidden_dim, num_hidden_layers)

    # One-time weight packing (block-diagonal, pre-transposed, bf16, lane-split).
    packed = pack_params(g_params, h_params, input_dim, hidden_dim,
                         num_hidden_layers)
    packed = jax.tree_util.tree_map(jax.block_until_ready, packed)

    fwd = jax.jit(functools.partial(parallel_risk_forward,
                                    input_dim=input_dim,
                                    num_hidden_layers=num_hidden_layers))
    out = fwd(x, packed)
    out = jax.block_until_ready(out)

    ref = reference_forward(x, g_params, h_params, input_dim, num_hidden_layers)

    assert out['g'].shape == (batch, 1) and out['h'].shape == (batch, input_dim)
    # bf16 matmul operands (f32 accumulation) -> looser tolerances vs f32 reference.
    assert jnp.allclose(out['g'], ref['g'], rtol=2e-2, atol=2e-2)
    assert jnp.allclose(out['h'], ref['h'], rtol=2e-2, atol=2e-2)

    print("KERNEL_OK")
</pallas_src>

<mosaic_0001>
module attributes {stable_mosaic.version = 11 : i64} {
  func.func @_fused_mlp_kernel(%arg0: i32, %arg1: memref<8x8xf32, #tpu.memory_space<vmem>>, %arg2: memref<8x128xbf16, #tpu.memory_space<vmem>>, %arg3: memref<1x128xf32, #tpu.memory_space<vmem>>, %arg4: memref<2x128x128xbf16, #tpu.memory_space<vmem>>, %arg5: memref<2x1x128xf32, #tpu.memory_space<vmem>>, %arg6: memref<128x128xbf16, #tpu.memory_space<vmem>>, %arg7: memref<8x32xbf16, #tpu.memory_space<vmem>>, %arg8: memref<1x32xf32, #tpu.memory_space<vmem>>, %arg9: memref<2x32x32xbf16, #tpu.memory_space<vmem>>, %arg10: memref<2x1x32xf32, #tpu.memory_space<vmem>>, %arg11: memref<32x128xbf16, #tpu.memory_space<vmem>>, %arg12: memref<1x128xf32, #tpu.memory_space<vmem>>, %arg13: memref<8x128xf32, #tpu.memory_space<vmem>>) attributes {dimension_semantics = [#tpu.dimension_semantics<parallel>], iteration_bounds = array<i64: 1>, scalar_prefetch = 0 : i64, scratch_operands = 0 : i64, tpu.core_type = #tpu.core_type<tc>, window_params = [{transform_indices = @transform_0, window_bounds = array<i64: 8, 8>}, {pipeline_mode = #tpu.pipeline_mode<synchronous>, transform_indices = @transform_1, window_bounds = array<i64: 8, 128>}, {pipeline_mode = #tpu.pipeline_mode<synchronous>, transform_indices = @transform_2, window_bounds = array<i64: 1, 128>}, {pipeline_mode = #tpu.pipeline_mode<synchronous>, transform_indices = @transform_3, window_bounds = array<i64: 2, 128, 128>}, {pipeline_mode = #tpu.pipeline_mode<synchronous>, transform_indices = @transform_4, window_bounds = array<i64: 2, 1, 128>}, {pipeline_mode = #tpu.pipeline_mode<synchronous>, transform_indices = @transform_5, window_bounds = array<i64: 128, 128>}, {pipeline_mode = #tpu.pipeline_mode<synchronous>, transform_indices = @transform_6, window_bounds = array<i64: 8, 32>}, {pipeline_mode = #tpu.pipeline_mode<synchronous>, transform_indices = @transform_7, window_bounds = array<i64: 1, 32>}, {pipeline_mode = #tpu.pipeline_mode<synchronous>, transform_indices = @transform_8, window_bounds = array<i64: 2, 32, 32>}, {pipeline_mode = #tpu.pipeline_mode<synchronous>, transform_indices = @transform_9, window_bounds = array<i64: 2, 1, 32>}, {pipeline_mode = #tpu.pipeline_mode<synchronous>, transform_indices = @transform_10, window_bounds = array<i64: 32, 128>}, {pipeline_mode = #tpu.pipeline_mode<synchronous>, transform_indices = @transform_11, window_bounds = array<i64: 1, 128>}, {transform_indices = @transform_12, window_bounds = array<i64: 8, 128>}]} {
    %c0 = arith.constant 0 : index
    %c0_0 = arith.constant 0 : index
    %0 = vector.load %arg1[%c0, %c0_0] : memref<8x8xf32, #tpu.memory_space<vmem>>, vector<8x8xf32>
    %1 = arith.truncf %0 : vector<8x8xf32> to vector<8x8xbf16>
    %c0_1 = arith.constant 0 : index
    %c0_2 = arith.constant 0 : index
    %2 = vector.load %arg12[%c0_1, %c0_2] : memref<1x128xf32, #tpu.memory_space<vmem>>, vector<1x128xf32>
    %c0_3 = arith.constant 0 : index
    %c0_4 = arith.constant 0 : index
    %3 = vector.load %arg2[%c0_3, %c0_4] : memref<8x128xbf16, #tpu.memory_space<vmem>>, vector<8x128xbf16>
    %cst = arith.constant dense<0.000000e+00> : vector<8x128xf32>
    %4 = tpu.matmul %1, %3, %cst {dimension_numbers = #tpu.dot_dimension_numbers<[1], [0], [0], [1], [0, 0, 1, 1], [], []>} : vector<8x8xbf16>, vector<8x128xbf16>, vector<8x128xf32> -> vector<8x128xf32>
    %c0_5 = arith.constant 0 : index
    %c0_6 = arith.constant 0 : index
    %5 = vector.load %arg3[%c0_5, %c0_6] : memref<1x128xf32, #tpu.memory_space<vmem>>, vector<1x128xf32>
    %6 = vector.broadcast %5 : vector<1x128xf32> to vector<8x128xf32>
    %7 = arith.addf %4, %6 : vector<8x128xf32>
    %cst_7 = arith.constant 0.000000e+00 : f32
    %8 = vector.broadcast %cst_7 : f32 to vector<8x128xf32>
    %9 = arith.maximumf %7, %8 : vector<8x128xf32>
    %10 = arith.truncf %9 : vector<8x128xf32> to vector<8x128xbf16>
    %c0_8 = arith.constant 0 : index
    %c0_9 = arith.constant 0 : index
    %c0_10 = arith.constant 0 : index
    %11 = vector.load %arg4[%c0_8, %c0_9, %c0_10] : memref<2x128x128xbf16, #tpu.memory_space<vmem>>, vector<1x128x128xbf16>
    %12 = vector.shape_cast %11 : vector<1x128x128xbf16> to vector<128x128xbf16>
    %cst_11 = arith.constant dense<0.000000e+00> : vector<8x128xf32>
    %13 = tpu.matmul %10, %12, %cst_11 {dimension_numbers = #tpu.dot_dimension_numbers<[1], [0], [0], [1], [0, 0, 1, 1], [], []>} : vector<8x128xbf16>, vector<128x128xbf16>, vector<8x128xf32> -> vector<8x128xf32>
    %c0_12 = arith.constant 0 : index
    %c0_13 = arith.constant 0 : index
    %c0_14 = arith.constant 0 : index
    %14 = vector.load %arg5[%c0_12, %c0_13, %c0_14] : memref<2x1x128xf32, #tpu.memory_space<vmem>>, vector<1x1x128xf32>
    %15 = vector.shape_cast %14 : vector<1x1x128xf32> to vector<1x128xf32>
    %16 = vector.broadcast %15 : vector<1x128xf32> to vector<8x128xf32>
    %17 = arith.addf %13, %16 : vector<8x128xf32>
    %cst_15 = arith.constant 0.000000e+00 : f32
    %18 = vector.broadcast %cst_15 : f32 to vector<8x128xf32>
    %19 = arith.maximumf %17, %18 : vector<8x128xf32>
    %20 = arith.truncf %19 : vector<8x128xf32> to vector<8x128xbf16>
    %c1 = arith.constant 1 : index
    %c0_16 = arith.constant 0 : index
    %c0_17 = arith.constant 0 : index
    %21 = vector.load %arg4[%c1, %c0_16, %c0_17] : memref<2x128x128xbf16, #tpu.memory_space<vmem>>, vector<1x128x128xbf16>
    %22 = vector.shape_cast %21 : vector<1x128x128xbf16> to vector<128x128xbf16>
    %cst_18 = arith.constant dense<0.000000e+00> : vector<8x128xf32>
    %23 = tpu.matmul %20, %22, %cst_18 {dimension_numbers = #tpu.dot_dimension_numbers<[1], [0], [0], [1], [0, 0, 1, 1], [], []>} : vector<8x128xbf16>, vector<128x128xbf16>, vector<8x128xf32> -> vector<8x128xf32>
    %c1_19 = arith.constant 1 : index
    %c0_20 = arith.constant 0 : index
    %c0_21 = arith.constant 0 : index
    %24 = vector.load %arg5[%c1_19, %c0_20, %c0_21] : memref<2x1x128xf32, #tpu.memory_space<vmem>>, vector<1x1x128xf32>
    %25 = vector.shape_cast %24 : vector<1x1x128xf32> to vector<1x128xf32>
    %26 = vector.broadcast %25 : vector<1x128xf32> to vector<8x128xf32>
    %27 = arith.addf %23, %26 : vector<8x128xf32>
    %cst_22 = arith.constant 0.000000e+00 : f32
    %28 = vector.broadcast %cst_22 : f32 to vector<8x128xf32>
    %29 = arith.maximumf %27, %28 : vector<8x128xf32>
    %30 = arith.truncf %29 : vector<8x128xf32> to vector<8x128xbf16>
    %c0_23 = arith.constant 0 : index
    %c0_24 = arith.constant 0 : index
    %31 = vector.load %arg6[%c0_23, %c0_24] : memref<128x128xbf16, #tpu.memory_space<vmem>>, vector<128x128xbf16>
    %cst_25 = arith.constant dense<0.000000e+00> : vector<8x128xf32>
    %32 = tpu.matmul %30, %31, %cst_25 {dimension_numbers = #tpu.dot_dimension_numbers<[1], [0], [0], [1], [0, 0, 1, 1], [], []>} : vector<8x128xbf16>, vector<128x128xbf16>, vector<8x128xf32> -> vector<8x128xf32>
    %33 = vector.broadcast %2 : vector<1x128xf32> to vector<8x128xf32>
    %34 = arith.addf %33, %32 : vector<8x128xf32>
    %c0_26 = arith.constant 0 : index
    %c0_27 = arith.constant 0 : index
    %35 = vector.load %arg7[%c0_26, %c0_27] : memref<8x32xbf16, #tpu.memory_space<vmem>>, vector<8x32xbf16>
    %cst_28 = arith.constant dense<0.000000e+00> : vector<8x32xf32>
    %36 = tpu.matmul %1, %35, %cst_28 {dimension_numbers = #tpu.dot_dimension_numbers<[1], [0], [0], [1], [0, 0, 1, 1], [], []>} : vector<8x8xbf16>, vector<8x32xbf16>, vector<8x32xf32> -> vector<8x32xf32>
    %c0_29 = arith.constant 0 : index
    %c0_30 = arith.constant 0 : index
    %37 = vector.load %arg8[%c0_29, %c0_30] : memref<1x32xf32, #tpu.memory_space<vmem>>, vector<1x32xf32>
    %38 = vector.broadcast %37 : vector<1x32xf32> to vector<8x32xf32>
    %39 = arith.addf %36, %38 : vector<8x32xf32>
    %cst_31 = arith.constant 0.000000e+00 : f32
    %40 = vector.broadcast %cst_31 : f32 to vector<8x32xf32>
    %41 = arith.maximumf %39, %40 : vector<8x32xf32>
    %42 = arith.truncf %41 : vector<8x32xf32> to vector<8x32xbf16>
    %c0_32 = arith.constant 0 : index
    %c0_33 = arith.constant 0 : index
    %c0_34 = arith.constant 0 : index
    %43 = vector.load %arg9[%c0_32, %c0_33, %c0_34] : memref<2x32x32xbf16, #tpu.memory_space<vmem>>, vector<1x32x32xbf16>
    %44 = vector.shape_cast %43 : vector<1x32x32xbf16> to vector<32x32xbf16>
    %cst_35 = arith.constant dense<0.000000e+00> : vector<8x32xf32>
    %45 = tpu.matmul %42, %44, %cst_35 {dimension_numbers = #tpu.dot_dimension_numbers<[1], [0], [0], [1], [0, 0, 1, 1], [], []>} : vector<8x32xbf16>, vector<32x32xbf16>, vector<8x32xf32> -> vector<8x32xf32>
    %c0_36 = arith.constant 0 : index
    %c0_37 = arith.constant 0 : index
    %c0_38 = arith.constant 0 : index
    %46 = vector.load %arg10[%c0_36, %c0_37, %c0_38] : memref<2x1x32xf32, #tpu.memory_space<vmem>>, vector<1x1x32xf32>
    %47 = vector.shape_cast %46 : vector<1x1x32xf32> to vector<1x32xf32>
    %48 = vector.broadcast %47 : vector<1x32xf32> to vector<8x32xf32>
    %49 = arith.addf %45, %48 : vector<8x32xf32>
    %cst_39 = arith.constant 0.000000e+00 : f32
    %50 = vector.broadcast %cst_39 : f32 to vector<8x32xf32>
    %51 = arith.maximumf %49, %50 : vector<8x32xf32>
    %52 = arith.truncf %51 : vector<8x32xf32> to vector<8x32xbf16>
    %c1_40 = arith.constant 1 : index
    %c0_41 = arith.constant 0 : index
    %c0_42 = arith.constant 0 : index
    %53 = vector.load %arg9[%c1_40, %c0_41, %c0_42] : memref<2x32x32xbf16, #tpu.memory_space<vmem>>, vector<1x32x32xbf16>
    %54 = vector.shape_cast %53 : vector<1x32x32xbf16> to vector<32x32xbf16>
    %cst_43 = arith.constant dense<0.000000e+00> : vector<8x32xf32>
    %55 = tpu.matmul %52, %54, %cst_43 {dimension_numbers = #tpu.dot_dimension_numbers<[1], [0], [0], [1], [0, 0, 1, 1], [], []>} : vector<8x32xbf16>, vector<32x32xbf16>, vector<8x32xf32> -> vector<8x32xf32>
    %c1_44 = arith.constant 1 : index
    %c0_45 = arith.constant 0 : index
    %c0_46 = arith.constant 0 : index
    %56 = vector.load %arg10[%c1_44, %c0_45, %c0_46] : memref<2x1x32xf32, #tpu.memory_space<vmem>>, vector<1x1x32xf32>
    %57 = vector.shape_cast %56 : vector<1x1x32xf32> to vector<1x32xf32>
    %58 = vector.broadcast %57 : vector<1x32xf32> to vector<8x32xf32>
    %59 = arith.addf %55, %58 : vector<8x32xf32>
    %cst_47 = arith.constant 0.000000e+00 : f32
    %60 = vector.broadcast %cst_47 : f32 to vector<8x32xf32>
    %61 = arith.maximumf %59, %60 : vector<8x32xf32>
    %62 = arith.truncf %61 : vector<8x32xf32> to vector<8x32xbf16>
    %c0_48 = arith.constant 0 : index
    %c0_49 = arith.constant 0 : index
    %63 = vector.load %arg11[%c0_48, %c0_49] : memref<32x128xbf16, #tpu.memory_space<vmem>>, vector<32x128xbf16>
    %cst_50 = arith.constant dense<0.000000e+00> : vector<8x128xf32>
    %64 = tpu.matmul %62, %63, %cst_50 {dimension_numbers = #tpu.dot_dimension_numbers<[1], [0], [0], [1], [0, 0, 1, 1], [], []>} : vector<8x32xbf16>, vector<32x128xbf16>, vector<8x128xf32> -> vector<8x128xf32>
    %65 = arith.addf %34, %64 : vector<8x128xf32>
    %c0_51 = arith.constant 0 : index
    %c0_52 = arith.constant 0 : index
    %66 = vector.load %arg13[%c0_51, %c0_52] : memref<8x128xf32, #tpu.memory_space<vmem>>, vector<8x128xf32>
    tpu.vector_store %arg13[%c0_51, %c0_52], %65 {strides = array<i32>} : memref<8x128xf32, #tpu.memory_space<vmem>>, vector<8x128xf32>,
    return
  }
  func.func @transform_0(%arg0: i32) -> (i32, i32) {
    %c0_i32 = arith.constant 0 : i32
    %c0_i32_0 = arith.constant 0 : i32
    return %arg0, %c0_i32 : i32, i32
  }
  func.func @transform_1(%arg0: i32) -> (i32, i32) {
    %c0_i32 = arith.constant 0 : i32
    %c0_i32_0 = arith.constant 0 : i32
    %c0_i32_1 = arith.constant 0 : i32
    return %c0_i32, %c0_i32_0 : i32, i32
  }
  func.func @transform_2(%arg0: i32) -> (i32, i32) {
    %c0_i32 = arith.constant 0 : i32
    %c0_i32_0 = arith.constant 0 : i32
    %c0_i32_1 = arith.constant 0 : i32
    return %c0_i32, %c0_i32_0 : i32, i32
  }
  func.func @transform_3(%arg0: i32) -> (i32, i32, i32) {
    %c0_i32 = arith.constant 0 : i32
    %c0_i32_0 = arith.constant 0 : i32
    %c0_i32_1 = arith.constant 0 : i32
    %c0_i32_2 = arith.constant 0 : i32
    return %c0_i32, %c0_i32_0, %c0_i32_1 : i32, i32, i32
  }
  func.func @transform_4(%arg0: i32) -> (i32, i32, i32) {
    %c0_i32 = arith.constant 0 : i32
    %c0_i32_0 = arith.constant 0 : i32
    %c0_i32_1 = arith.constant 0 : i32
    %c0_i32_2 = arith.constant 0 : i32
    return %c0_i32, %c0_i32_0, %c0_i32_1 : i32, i32, i32
  }
  func.func @transform_5(%arg0: i32) -> (i32, i32) {
    %c0_i32 = arith.constant 0 : i32
    %c0_i32_0 = arith.constant 0 : i32
    %c0_i32_1 = arith.constant 0 : i32
    return %c0_i32, %c0_i32_0 : i32, i32
  }
  func.func @transform_6(%arg0: i32) -> (i32, i32) {
    %c0_i32 = arith.constant 0 : i32
    %c0_i32_0 = arith.constant 0 : i32
    %c0_i32_1 = arith.constant 0 : i32
    return %c0_i32, %c0_i32_0 : i32, i32
  }
  func.func @transform_7(%arg0: i32) -> (i32, i32) {
    %c0_i32 = arith.constant 0 : i32
    %c0_i32_0 = arith.constant 0 : i32
    %c0_i32_1 = arith.constant 0 : i32
    return %c0_i32, %c0_i32_0 : i32, i32
  }
  func.func @transform_8(%arg0: i32) -> (i32, i32, i32) {
    %c0_i32 = arith.constant 0 : i32
    %c0_i32_0 = arith.constant 0 : i32
    %c0_i32_1 = arith.constant 0 : i32
    %c0_i32_2 = arith.constant 0 : i32
    return %c0_i32, %c0_i32_0, %c0_i32_1 : i32, i32, i32
  }
  func.func @transform_9(%arg0: i32) -> (i32, i32, i32) {
    %c0_i32 = arith.constant 0 : i32
    %c0_i32_0 = arith.constant 0 : i32
    %c0_i32_1 = arith.constant 0 : i32
    %c0_i32_2 = arith.constant 0 : i32
    return %c0_i32, %c0_i32_0, %c0_i32_1 : i32, i32, i32
  }
  func.func @transform_10(%arg0: i32) -> (i32, i32) {
    %c0_i32 = arith.constant 0 : i32
    %c0_i32_0 = arith.constant 0 : i32
    %c0_i32_1 = arith.constant 0 : i32
    return %c0_i32, %c0_i32_0 : i32, i32
  }
  func.func @transform_11(%arg0: i32) -> (i32, i32) {
    %c0_i32 = arith.constant 0 : i32
    %c0_i32_0 = arith.constant 0 : i32
    %c0_i32_1 = arith.constant 0 : i32
    return %c0_i32, %c0_i32_0 : i32, i32
  }
  func.func @transform_12(%arg0: i32) -> (i32, i32) {
    %c0_i32 = arith.constant 0 : i32
    %c0_i32_0 = arith.constant 0 : i32
    return %arg0, %c0_i32 : i32, i32
  }
}

</mosaic_0001>

<bundles_post_ra>
// kernel: parallel_risk_forward.1
= control target key start
LH: loop header
LB: loop body
LE: loop exit
PB: predicated region body
PF: predicated region fallthrough
CT: control target
= control target key end

     0   :  { %17 = vsyncpa [#allocation3], 0  ;;  %s1551_s0 = inlined_call_operand.vmem [shape: f32[8,8], index: 0, kind: input, shape index: {}]   ;;  %s1552_s1 = inlined_call_operand.hbm [shape: bf16[8,128], index: 1, kind: input, shape index: {}]   ;;  %s1553_s2 = inlined_call_operand.hbm [shape: f32[1,128], index: 2, kind: input, shape index: {}]   ;;  %s1554_s3 = inlined_call_operand.hbm [shape: bf16[2,128,128], index: 3, kind: input, shape index: {}]   ;;  %s1555_s4 = inlined_call_operand.hbm [shape: f32[2,1,128], index: 4, kind: input, shape index: {}]   ;;  %s1556_s5 = inlined_call_operand.hbm [shape: bf16[128,128], index: 5, kind: input, shape index: {}]   ;;  %s1557_s6 = inlined_call_operand.hbm [shape: bf16[8,32], index: 6, kind: input, shape index: {}]   ;;  %s1558_s7 = inlined_call_operand.hbm [shape: f32[1,32], index: 7, kind: input, shape index: {}]   ;;  %s1559_s8 = inlined_call_operand.vmem [shape: bf16[2,32,32], index: 8, kind: input, shape index: {}]   ;;  %s1560_s9 = inlined_call_operand.hbm [shape: f32[2,1,32], index: 9, kind: input, shape index: {}]   ;;  %s1561_s10 = inlined_call_operand.vmem [shape: bf16[32,128], index: 10, kind: input, shape index: {}]   ;;  %s1562_s11 = inlined_call_operand.hbm [shape: f32[1,128], index: 11, kind: input, shape index: {}]   ;;  %s1563_s12 = inlined_call_operand.vmem [shape: f32[8,128], index: 12, kind: output, shape index: {}]  }
   0x1   :  { %18 = vsyncpa [#allocation5], 0 }
   0x2   :  { %19 = vsyncpa [#allocation8], 0 }
   0x3   :  { %20 = vsyncpa [#allocation11], 0 }
   0x4   :  { %21 = vsyncpa [#allocation14], 0  ;;  %s1253_s21 = smov [#allocation4]   ;;  %s1254_s23 = smov [#allocation7]  }
   0x5   :  { %s40_s22 = sshll.u32 %s1253_s21, 4  ;;  %s61_s24 = sshll.u32 %s1254_s23, 4  ;;  %s41_s22 = int_to_ptr.vmem [resolvable:$true] %s40_s22  ;;  %s1333_s24 = int_to_ptr.vmem [resolvable:$true] %s61_s24 }
   0x6   :  { %s1045_s27 = scalar_lea.hbm %s1553_s2, 16 }
   0x7   :  { %p1046_p0 = scmp.ne.s32.totalorder %s1553_s2, %s1045_s27  ;;  %p1049_p1 = scmp.lt.u32.totalorder %s1045_s27, %s1553_s2 }
   0x9   :  { %p1051_p2 = pnand %p1049_p1, %p1046_p0 }
   0xb   :  { %1054 = shalt.err (!%p1051_p2)
}
   0xc   :  { %s1055_s14 = scalar_lea.vmem %s41_s22, 16  ;;  %s1059_s15 = scalar_lea.vmem %s41_s22, 32 }
   0xd   :  { %p1056_p3 = scmp.ne.s32.totalorder %s41_s22, %s1055_s14  ;;  %p1060_p4 = scmp.lt.s32.totalorder %s41_s22, %s41_s22 }
   0xe   :  { %p1061_p5 = scmp.lt.s32.totalorder %s1059_s15, %s1055_s14 }
  0x10   :  { %p1062_p6 = por %p1061_p5, %p1060_p4 }
  0x12   :  { %p1063_p7 = pnand %p1062_p6, %p1056_p3 }
  0x14   :  { %1066 = shalt.err (!%p1063_p7)
}
  0x15   :  { %43 = dma.hbm_to_vmem [thread:$0]  %s1553_s2, 16, %s41_s22, [#allocation5]  }
  0x16   :  { %s1067_s20 = scalar_lea.hbm %s1555_s4, 32 }
  0x17   :  { %p1068_p8 = scmp.ne.s32.totalorder %s1555_s4, %s1067_s20  ;;  %p1071_p9 = scmp.lt.u32.totalorder %s1067_s20, %s1555_s4 }
  0x19   :  { %p1073_p10 = pnand %p1071_p9, %p1068_p8 }
  0x1b   :  { %1076 = shalt.err (!%p1073_p10)
}
  0x1c   :  { %s1077_s27 = scalar_lea.vmem %s1333_s24, 32  ;;  %p1082_p12 = scmp.lt.s32.totalorder %s1333_s24, %s1333_s24 }
  0x1d   :  { %p1078_p11 = scmp.ne.s32.totalorder %s1333_s24, %s1077_s27  ;;  %p1083_p13 = scmp.lt.s32.totalorder %s1077_s27, %s1077_s27 }
  0x1f   :  { %p1084_p0 = por %p1083_p13, %p1082_p12 }
  0x21   :  { %p1085_p1 = pnand %p1084_p0, %p1078_p11 }
  0x23   :  { %1088 = shalt.err (!%p1085_p1)
}
  0x24   :  { %s1255_s2 = smov 16   ;;  %s1256_s22 = smov 1  }
  0x25   :  { %67 = dma.hbm_to_vmem [thread:$0]  %s1555_s4, 32, %s1333_s24, [#allocation8], %s1255_s2, %s1255_s2, %s1256_s22  }
  0x26   :  { %s1257_s30 = smov [#allocation10]   ;;  %s1258_s14 = smov [#allocation13]  }
  0x27   :  { %s86_s13 = sshll.u32 %s1257_s30, 4  ;;  %s107_s15 = sshll.u32 %s1258_s14, 4  ;;  %s87_s13 = int_to_ptr.vmem [resolvable:$true] %s86_s13  ;;  %s1367_s15 = int_to_ptr.vmem [resolvable:$true] %s107_s15 }
  0x28   :  { %s1089_s18 = scalar_lea.hbm %s1557_s6, 64 }
  0x29   :  { %p1090_p2 = scmp.ne.s32.totalorder %s1557_s6, %s1089_s18  ;;  %p1093_p3 = scmp.lt.u32.totalorder %s1089_s18, %s1557_s6 }
  0x2b   :  { %p1095_p4 = pnand %p1093_p3, %p1090_p2 }
  0x2d   :  { %1098 = shalt.err (!%p1095_p4)
}
  0x2e   :  { %s1099_s4 = scalar_lea.vmem %s87_s13, 64  ;;  %p1104_p6 = scmp.lt.s32.totalorder %s87_s13, %s87_s13 }
  0x2f   :  { %p1100_p5 = scmp.ne.s32.totalorder %s87_s13, %s1099_s4  ;;  %p1105_p7 = scmp.lt.s32.totalorder %s1099_s4, %s1099_s4 }
  0x31   :  { %p1106_p8 = por %p1105_p7, %p1104_p6 }
  0x33   :  { %p1107_p9 = pnand %p1106_p8, %p1100_p5 }
  0x35   :  { %1110 = shalt.err (!%p1107_p9)
}
  0x36   :  { %89 = dma.hbm_to_vmem [thread:$0]  %s1557_s6, 64, %s87_s13, [#allocation11]  }
  0x37   :  { %s1111_s28 = scalar_lea.hbm %s1560_s9, 32 }
  0x38   :  { %p1112_p10 = scmp.ne.s32.totalorder %s1560_s9, %s1111_s28  ;;  %p1115_p11 = scmp.lt.u32.totalorder %s1111_s28, %s1560_s9 }
  0x3a   :  { %p1117_p12 = pnand %p1115_p11, %p1112_p10 }
  0x3c   :  { %1120 = shalt.err (!%p1117_p12)
}
  0x3d   :  { %s1121_s17 = scalar_lea.vmem %s1367_s15, 32  ;;  %p1126_p0 = scmp.lt.s32.totalorder %s1367_s15, %s1367_s15 }
  0x3e   :  { %p1122_p13 = scmp.ne.s32.totalorder %s1367_s15, %s1121_s17  ;;  %p1127_p1 = scmp.lt.s32.totalorder %s1121_s17, %s1121_s17 }
  0x40   :  { %p1128_p2 = por %p1127_p1, %p1126_p0 }
  0x42   :  { %p1129_p3 = pnand %p1128_p2, %p1122_p13 }
  0x44   :  { %1132 = shalt.err (!%p1129_p3)
}
  0x45   :  { %113 = dma.hbm_to_vmem [thread:$0]  %s1560_s9, 32, %s1367_s15, [#allocation14], %s1255_s2, %s1255_s2, %s1256_s22  }
  0x46   :  { %s1259_s18 = smov [#allocation2]   ;;  %s1260_s20 = smov [#allocation6]  }
  0x47   :  { %s30_s19 = sshll.u32 %s1259_s18, 4  ;;  %s49_s21 = sshll.u32 %s1260_s20, 4  ;;  %s31_s19 = int_to_ptr.vmem [resolvable:$true] %s30_s19  ;;  %s1401_s21 = int_to_ptr.vmem [resolvable:$true] %s49_s21 }
  0x48   :  { %s1133_s24 = scalar_lea.hbm %s1552_s1, 64 }
  0x49   :  { %p1134_p4 = scmp.ne.s32.totalorder %s1552_s1, %s1133_s24  ;;  %p1137_p5 = scmp.lt.u32.totalorder %s1133_s24, %s1552_s1 }
  0x4b   :  { %p1139_p6 = pnand %p1137_p5, %p1134_p4 }
  0x4d   :  { %1142 = shalt.err (!%p1139_p6)
}
  0x4e   :  { %s1143_s9 = scalar_lea.vmem %s31_s19, 64  ;;  %p1148_p8 = scmp.lt.s32.totalorder %s31_s19, %s31_s19 }
  0x4f   :  { %p1144_p7 = scmp.ne.s32.totalorder %s31_s19, %s1143_s9  ;;  %p1149_p9 = scmp.lt.s32.totalorder %s1143_s9, %s1143_s9 }
  0x51   :  { %p1150_p10 = por %p1149_p9, %p1148_p8 }
  0x53   :  { %p1151_p11 = pnand %p1150_p10, %p1144_p7 }
  0x55   :  { %1154 = shalt.err (!%p1151_p11)
}
  0x56   :  { %33 = dma.hbm_to_vmem [thread:$0]  %s1552_s1, 64, %s31_s19, [#allocation3]  }
  0x57   :  { %s1155_s30 = scalar_lea.hbm %s1554_s3, 2048 }
  0x58   :  { %p1156_p12 = scmp.ne.s32.totalorder %s1554_s3, %s1155_s30  ;;  %p1159_p13 = scmp.lt.u32.totalorder %s1155_s30, %s1554_s3 }
  0x5a   :  { %p1161_p0 = pnand %p1159_p13, %p1156_p12 }
  0x5c   :  { %1164 = shalt.err (!%p1161_p0)
}
  0x5d   :  { %s1165_s13 = scalar_lea.vmem %s1401_s21, 2048  ;;  %p1170_p2 = scmp.lt.s32.totalorder %s1401_s21, %s1401_s21 }
  0x5e   :  { %p1166_p1 = scmp.ne.s32.totalorder %s1401_s21, %s1165_s13  ;;  %p1171_p3 = scmp.lt.s32.totalorder %s1165_s13, %s1165_s13 }
  0x60   :  { %p1172_p4 = por %p1171_p3, %p1170_p2 }
  0x62   :  { %p1173_p5 = pnand %p1172_p4, %p1166_p1 }
  0x64   :  { %1176 = shalt.err (!%p1173_p5)
}
  0x65   :  { %s1261_s1 = smov 64   ;;  %s1262_s18 = smov 4  }
  0x66   :  { %55 = dma.hbm_to_vmem [thread:$0]  %s1554_s3, 2048, %s1401_s21, [#allocation5], %s1261_s1, %s1261_s1, %s1262_s18  }
  0x67   :  { %s1263_s23 = smov [#allocation9]   ;;  %s1264_s24 = smov [#allocation12]  }
  0x68   :  { %s73_s4 = sshll.u32 %s1263_s23, 4  ;;  %s96_s25 = sshll.u32 %s1264_s24, 4  ;;  %s74_s4 = int_to_ptr.vmem [resolvable:$true] %s73_s4  ;;  %s97_s25 = int_to_ptr.vmem [resolvable:$true] %s96_s25 }
  0x69   :  { %s1177_s28 = scalar_lea.hbm %s1556_s5, 1024 }
  0x6a   :  { %p1178_p6 = scmp.ne.s32.totalorder %s1556_s5, %s1177_s28  ;;  %p1181_p7 = scmp.lt.u32.totalorder %s1177_s28, %s1556_s5 }
  0x6c   :  { %p1183_p8 = pnand %p1181_p7, %p1178_p6 }
  0x6e   :  { %1186 = shalt.err (!%p1183_p8)
}
  0x6f   :  { %s1187_s3 = scalar_lea.vmem %s74_s4, 1024  ;;  %p1192_p10 = scmp.lt.s32.totalorder %s74_s4, %s74_s4 }
  0x70   :  { %p1188_p9 = scmp.ne.s32.totalorder %s74_s4, %s1187_s3  ;;  %p1193_p11 = scmp.lt.s32.totalorder %s1187_s3, %s1187_s3 }
  0x72   :  { %p1194_p12 = por %p1193_p11, %p1192_p10 }
  0x74   :  { %p1195_p13 = pnand %p1194_p12, %p1188_p9 }
  0x76   :  { %1198 = shalt.err (!%p1195_p13)
}
  0x77   :  { %79 = dma.hbm_to_vmem [thread:$0]  %s1556_s5, 1024, %s74_s4, [#allocation8], %s1261_s1, %s1261_s1, %s1262_s18  }
  0x78   :  { %s1199_s16 = scalar_lea.hbm %s1558_s7, 16 }
  0x79   :  { %p1200_p0 = scmp.ne.s32.totalorder %s1558_s7, %s1199_s16  ;;  %p1203_p1 = scmp.lt.u32.totalorder %s1199_s16, %s1558_s7 }
  0x7b   :  { %p1205_p2 = pnand %p1203_p1, %p1200_p0 }
  0x7d   :  { %1208 = shalt.err (!%p1205_p2)
}
  0x7e   :  { %s1209_s20 = scalar_lea.vmem %s97_s25, 16  ;;  %s1213_s23 = scalar_lea.vmem %s97_s25, 32 }
  0x7f   :  { %p1210_p3 = scmp.ne.s32.totalorder %s97_s25, %s1209_s20  ;;  %p1214_p4 = scmp.lt.s32.totalorder %s97_s25, %s97_s25 }
  0x80   :  { %p1215_p5 = scmp.lt.s32.totalorder %s1213_s23, %s1209_s20 }
  0x82   :  { %p1216_p6 = por %p1215_p5, %p1214_p4 }
  0x84   :  { %p1217_p7 = pnand %p1216_p6, %p1210_p3 }
  0x86   :  { %1220 = shalt.err (!%p1217_p7)
}
  0x87   :  { %99 = dma.hbm_to_vmem [thread:$0]  %s1558_s7, 16, %s97_s25, [#allocation11]  }
  0x88   :  { %s1265_s18 = smov [#allocation15]   ;;  %s1221_s27 = scalar_lea.hbm %s1562_s11, 16 }
  0x89   :  { %s122_s4 = sshll.u32 %s1265_s18, 4  ;;  %p1222_p8 = scmp.ne.s32.totalorder %s1562_s11, %s1221_s27  ;;  %s123_s4 = int_to_ptr.vmem [resolvable:$true] %s122_s4 }
  0x8a   :  { %p1225_p9 = scmp.lt.u32.totalorder %s1221_s27, %s1562_s11 }
  0x8c   :  { %p1227_p10 = pnand %p1225_p9, %p1222_p8 }
  0x8e   :  { %1230 = shalt.err (!%p1227_p10)
}
  0x8f   :  { %s1231_s15 = scalar_lea.vmem %s123_s4, 16  ;;  %s1235_s7 = scalar_lea.vmem %s123_s4, 32 }
  0x90   :  { %p1232_p11 = scmp.ne.s32.totalorder %s123_s4, %s1231_s15  ;;  %p1236_p12 = scmp.lt.s32.totalorder %s123_s4, %s123_s4 }
  0x91   :  { %p1237_p13 = scmp.lt.s32.totalorder %s1235_s7, %s1231_s15 }
  0x93   :  { %p1238_p0 = por %p1237_p13, %p1236_p12 }
  0x95   :  { %p1239_p1 = pnand %p1238_p0, %p1232_p11 }
  0x97   :  { %1242 = shalt.err (!%p1239_p1)
}
  0x98   :  { %125 = dma.hbm_to_vmem [thread:$0]  %s1562_s11, 16, %s123_s4, [#allocation14]  }
  0x99   :  { %1243 = dma.done.wait [#allocation3], 64  }
  0x9a   :  { %1244 = vsyncadd [#allocation3], 4294967232 }
  0x9b   :  { %1245 = dma.done.wait [#allocation5], 2064  }
  0x9c   :  { %1246 = vsyncadd [#allocation5], 4294965232 }
  0x9d   :  { %1247 = dma.done.wait [#allocation8], 1056  }
  0x9e   :  { %1248 = vsyncadd [#allocation8], 4294966240 }
  0x9f   :  { %1249 = dma.done.wait [#allocation11], 80  }
  0xa0   :  { %1250 = vsyncadd [#allocation11], 4294967216 }
  0xa1   :  { %1251 = dma.done.wait [#allocation14], 48  }
  0xa2   :  { %1252 = vsyncadd [#allocation14], 4294967248  ;;  %v1266_v0 = vmov 0.0   ;;  %vm1267_vm0 = vmmov 0   ;;  %vm169_vm1 = vcmask 1043456   ;;  %v154_v2 = vld [vmem:[%s1551_s0] sm:$0xff] }
  0xa3   :  { %902 = vmatprep.subr.bf16.mxu0 %v1266_v0  ;;  %904 = vmatprep.mubr.msk.bf16.mxu0 %vm1267_vm0, %v1266_v0  ;;  %v157_v1 = vld [vmem:[#allocation2] sm:$0xf]  ;;  %v1478_v4 = vpack.c.bf16 %v154_v2, %v154_v2  ;;  %vm165_vm2 = vcmask 64512   ;;  %v1015_v5 = vld [vmem:[#allocation6] sm:$0xff]   ;;  %v1016_v6 = vld [vmem:[#allocation6 + $0x8] sm:$0xff]   ;;  %vm630_vm3 = vcmask 261120  }
  0xa4   :  { %908 = vmatprep.subr.bf16.mxu1 %v1266_v0  ;;  %924 = vmatprep.mubr.msk.bf16.mxu1 %vm1267_vm0, %v1266_v0  ;;  %v171_v3 = vsel %vm169_vm1, %v157_v1, 0  ;;  %v1017_v7 = vld [vmem:[#allocation6 + $0x10] sm:$0xff]   ;;  %v1018_v8 = vld [vmem:[#allocation6 + $0x18] sm:$0xff]   ;;  %v1019_v9 = vld [vmem:[#allocation6 + $0x20] sm:$0xff]  }
  0xa5   :  { %903 = vmatpush3.bf16.msra.mxu0 %v171_v3  ;;  %909 = vmatpush3.bf16.msra.mxu1 %v1015_v5  ;;  %v1020_v10 = vld [vmem:[#allocation6 + $0x28] sm:$0xff]   ;;  %v1021_v11 = vld [vmem:[#allocation6 + $0x30] sm:$0xff]   ;;  %v1022_v12 = vld [vmem:[#allocation6 + $0x38] sm:$0xff]  }
  0xa6   :  { %928 = vmatprep.subr.bf16.mxu0 %v1266_v0  ;;  %910 = vmatprep.subr.bf16.mxu1 %v1266_v0  ;;  %v1023_v13 = vld [vmem:[#allocation6 + $0x40] sm:$0xff]   ;;  %v1024_v14 = vld [vmem:[#allocation6 + $0x48] sm:$0xff]   ;;  %v1025_v15 = vld [vmem:[#allocation6 + $0x50] sm:$0xff]  }
  0xa7   :  { %v1026_v16 = vld [vmem:[#allocation6 + $0x58] sm:$0xff]   ;;  %v1027_v17 = vld [vmem:[#allocation6 + $0x60] sm:$0xff]   ;;  %v1028_v18 = vld [vmem:[#allocation6 + $0x68] sm:$0xff]  }
  0xa8   :  { %905 = vmatmul.mubr.msk.bf16.vlgmr.msra.gmra.mrb[0].mxu0 %vm165_vm2, %v1478_v4  ;;  %v1029_v19 = vld [vmem:[#allocation6 + $0x70] sm:$0xff]   ;;  %v816_v20 = vld [vmem:[#allocation4] ss:$0 sm:$0xff]  ;;  %v1031_v29 = vld [vmem:[#allocation9] sm:$0xff]  }
  0xa9   :  { %944 = vmatprep.mubr.msk.bf16.mxu0 %vm1267_vm0, %v1266_v0  ;;  %911 = vmatpush3.bf16.msra.mxu1 %v1016_v6  ;;  %v1030_v28 = vld [vmem:[#allocation6 + $0x78] sm:$0xff]   ;;  %v1032_v30 = vld [vmem:[#allocation9 + $0x8] sm:$0xff]   ;;  %v1035_v33 = vld [vmem:[#allocation9 + $0x20] sm:$0xff]  }
  0xaa   :  { %912 = vmatprep.subr.bf16.mxu1 %v1266_v0  ;;  %929 = vmatpush3.bf16.msra.mxu0 %v1023_v13  ;;  %v1033_v31 = vld [vmem:[#allocation9 + $0x10] sm:$0xff]   ;;  %v1034_v32 = vld [vmem:[#allocation9 + $0x18] sm:$0xff]   ;;  %v1036_v34 = vld [vmem:[#allocation9 + $0x28] sm:$0xff]  }
  0xab   :  { %930 = vmatprep.subr.bf16.mxu0 %v1266_v0  ;;  %v818_v35 = vld [vmem:[#allocation7] ss:$0 sm:$0xff]  ;;  %v554_v39 = vld [vmem:[#allocation10] sm:$0xf]  ;;  %v1037_v45 = vld [vmem:[#allocation9 + $0x30] sm:$0xff]  }
  0xac   :  { %v563_v43 = vsel %vm169_vm1, %v554_v39, 0  ;;  %v1038_v46 = vld [vmem:[#allocation9 + $0x38] sm:$0xff]   ;;  %v1039_v47 = vld [vmem:[%s1559_s8] sm:$0xff]   ;;  %v1040_v48 = vld [vmem:[%s1559_s8 + $0x8] sm:$0xff]  }
  0xad   :  { %913 = vmatpush3.bf16.msra.mxu1 %v1017_v7  ;;  %v827_v49 = vld [vmem:[#allocation7 + $0x1] ss:$0 sm:$0xff]  ;;  %v845_v57 = vld [vmem:[#allocation12] ss:$0 sm:$0xff] }
  0xae   :  { %914 = vmatprep.subr.bf16.mxu1 %v1266_v0  ;;  %931 = vmatpush3.bf16.msra.mxu0 %v1024_v14  ;;  %v1041_v2 = vld [vmem:[%s1559_s8 + $0x10] sm:$0xff]   ;;  %v1042_v3 = vld [vmem:[%s1559_s8 + $0x18] sm:$0xff]  }
  0xaf   :  { %932 = vmatprep.subr.bf16.mxu0 %v1266_v0 }
  0xb1   :  { %915 = vmatpush3.bf16.msra.mxu1 %v1018_v8  ;;  %v847_v8 = vld [vmem:[#allocation13] ss:$0 sm:$0xff] }
  0xb2   :  { %916 = vmatprep.subr.bf16.mxu1 %v1266_v0  ;;  %933 = vmatpush3.bf16.msra.mxu0 %v1025_v15  ;;  %v1043_v15 = vld [vmem:[%s1561_s10] sm:$0xff]  }
  0xb3   :  { %934 = vmatprep.subr.bf16.mxu0 %v1266_v0 }
  0xb5   :  { %917 = vmatpush3.bf16.msra.mxu1 %v1019_v9 }
  0xb6   :  { %918 = vmatprep.subr.bf16.mxu1 %v1266_v0  ;;  %935 = vmatpush3.bf16.msra.mxu0 %v1026_v16 }
  0xb7   :  { %936 = vmatprep.subr.bf16.mxu0 %v1266_v0 }
  0xb9   :  { %919 = vmatpush3.bf16.msra.mxu1 %v1020_v10 }
  0xba   :  { %920 = vmatprep.subr.bf16.mxu1 %v1266_v0  ;;  %937 = vmatpush3.bf16.msra.mxu0 %v1027_v17  ;;  %v1044_v17 = vld [vmem:[%s1561_s10 + $0x8] sm:$0xff]  }
  0xbb   :  { %938 = vmatprep.subr.bf16.mxu0 %v1266_v0 }
  0xbd   :  { %921 = vmatpush3.bf16.msra.mxu1 %v1021_v11 }
  0xbe   :  { %922 = vmatprep.subr.bf16.mxu1 %v1266_v0  ;;  %939 = vmatpush3.bf16.msra.mxu0 %v1028_v18  ;;  %v855_v18 = vld [vmem:[#allocation13 + $0x1] ss:$0 sm:$0xff] }
  0xbf   :  { %940 = vmatprep.subr.bf16.mxu0 %v1266_v0 }
  0xc1   :  { %923 = vmatpush3.bf16.msra.mxu1 %v1022_v12 }
  0xc2   :  { %948 = vmatprep.subr.bf16.mxu1 %v1266_v0  ;;  %941 = vmatpush3.bf16.msra.mxu0 %v1029_v19 }
  0xc3   :  { %942 = vmatprep.subr.bf16.mxu0 %v1266_v0 }
  0xc6   :  { %943 = vmatpush3.bf16.msra.mxu0 %v1030_v28 }
  0xc7   :  { %968 = vmatprep.subr.bf16.mxu0 %v1266_v0 }
 0x17b   :  { %v207_v21 = vpop.f32.mrb[0].mxu0 }
 0x17c   :  { %v208_v22 = vadd.f32 %v816_v20, %v207_v21  ;;  %v906_v23 = vpop.f32.mrb[1].mxu0 }
 0x17d   :  { %v210_v24 = vpop.f32.mrb[2].mxu0 }
 0x17e   :  { %v213_v25 = vmax.f32 %v208_v22, 0.0  ;;  %v907_v26 = vpop.f32.mrb[3].mxu0 }
 0x17f   :  { %v844_v26 = vld [vmem:[#allocation15] ss:$0 sm:$0xff] }
 0x180   :  { %v214_v27 = vpack.c.bf16 %v213_v25, %v213_v25 }
 0x182   :  { %925 = vmatmul.mubr.bf16.vlgmr.msra.gmra.mrb[0].mxu1 %v214_v27 }
 0x183   :  { %964 = vmatprep.mubr.msk.bf16.mxu1 %vm1267_vm0, %v1266_v0  ;;  %949 = vmatpush3.bf16.msra.mxu1 %v1031_v29 }
 0x184   :  { %950 = vmatprep.subr.bf16.mxu1 %v1266_v0 }
 0x187   :  { %951 = vmatpush3.bf16.msra.mxu1 %v1032_v30 }
 0x188   :  { %952 = vmatprep.subr.bf16.mxu1 %v1266_v0 }
 0x18b   :  { %953 = vmatpush3.bf16.msra.mxu1 %v1033_v31 }
 0x18c   :  { %954 = vmatprep.subr.bf16.mxu1 %v1266_v0 }
 0x18f   :  { %955 = vmatpush3.bf16.msra.mxu1 %v1034_v32 }
 0x190   :  { %956 = vmatprep.subr.bf16.mxu1 %v1266_v0 }
 0x193   :  { %957 = vmatpush3.bf16.msra.mxu1 %v1035_v33 }
 0x194   :  { %958 = vmatprep.subr.bf16.mxu1 %v1266_v0 }
 0x197   :  { %959 = vmatpush3.bf16.msra.mxu1 %v1036_v34 }
 0x198   :  { %960 = vmatprep.subr.bf16.mxu1 %v1266_v0 }
 0x19b   :  { %961 = vmatpush3.bf16.msra.mxu1 %v1037_v45 }
 0x19c   :  { %962 = vmatprep.subr.bf16.mxu1 %v1266_v0 }
 0x19f   :  { %963 = vmatpush3.bf16.msra.mxu1 %v1038_v46 }
 0x255   :  { %v320_v36 = vpop.f32.mrb[0].mxu1 }
 0x256   :  { %v321_v37 = vadd.f32 %v818_v35, %v320_v36  ;;  %v926_v38 = vpop.f32.mrb[1].mxu1 }
 0x257   :  { %v323_v40 = vpop.f32.mrb[2].mxu1 }
 0x258   :  { %v326_v41 = vmax.f32 %v321_v37, 0.0  ;;  %v927_v42 = vpop.f32.mrb[3].mxu1 }
 0x25a   :  { %v327_v44 = vpack.c.bf16 %v326_v41, %v326_v41 }
 0x25c   :  { %945 = vmatmul.mubr.bf16.vlgmr.msra.gmra.mrb[4].mxu0 %v327_v44 }
 0x25d   :  { %969 = vmatpush3.bf16.msra.mxu0 %v563_v43  ;;  %970 = vmatprep.mubr.msk.bf16.mxu0 %vm1267_vm0, %v1266_v0 }
 0x25e   :  { %974 = vmatprep.subr.bf16.mxu0 %v1266_v0 }
 0x264   :  { %971 = vmatmul.mubr.msk.bf16.vlgmr.msra.gmra.mrb[8].mxu0 %vm165_vm2, %v1478_v4 }
 0x265   :  { %978 = vmatprep.mubr.msk.bf16.mxu0 %vm1267_vm0, %v1266_v0  ;;  %975 = vmatpush3.bf16.msra.mxu0 %v1039_v47 }
 0x266   :  { %976 = vmatprep.subr.bf16.mxu0 %v1266_v0 }
 0x269   :  { %977 = vmatpush3.bf16.msra.mxu0 %v1040_v48 }
 0x26a   :  { %982 = vmatprep.subr.bf16.mxu0 %v1266_v0 }
 0x32f   :  { %v435_v50 = vpop.f32.mrb[4].mxu0 }
 0x330   :  { %v436_v51 = vadd.f32 %v827_v49, %v435_v50  ;;  %v946_v52 = vpop.f32.mrb[5].mxu0 }
 0x331   :  { %v438_v53 = vpop.f32.mrb[6].mxu0 }
 0x332   :  { %v441_v54 = vmax.f32 %v436_v51, 0.0  ;;  %v947_v55 = vpop.f32.mrb[7].mxu0 }
 0x334   :  { %v442_v56 = vpack.c.bf16 %v441_v54, %v441_v54 }
 0x336   :  { %965 = vmatmul.mubr.bf16.vlgmr.msra.gmra.mrb[4].mxu1 %v442_v56 }
 0x337   :  { %v599_v58 = vpop.f32.mrb[8].mxu0 }
 0x338   :  { %v600_v59 = vadd.f32 %v845_v57, %v599_v58  ;;  %v972_v60 = vpop.f32.mrb[9].mxu0 }
 0x339   :  { %v602_v61 = vpop.f32.mrb[10].mxu0 }
 0x33a   :  { %v605_v62 = vmax.f32 %v600_v59, 0.0  ;;  %v973_v63 = vpop.f32.mrb[11].mxu0 }
 0x33c   :  { %v606_v1 = vpack.c.bf16 %v605_v62, %v605_v62 }
 0x33e   :  { %979 = vmatmul.mubr.msk.bf16.vlgmr.msra.gmra.mrb[12].mxu0 %vm630_vm3, %v606_v1 }
 0x33f   :  { %986 = vmatprep.mubr.msk.bf16.mxu0 %vm1267_vm0, %v1266_v0  ;;  %983 = vmatpush3.bf16.msra.mxu0 %v1041_v2 }
 0x340   :  { %984 = vmatprep.subr.bf16.mxu0 %v1266_v0 }
 0x343   :  { %985 = vmatpush3.bf16.msra.mxu0 %v1042_v3 }
 0x344   :  { %990 = vmatprep.subr.bf16.mxu0 %v1266_v0 }
 0x409   :  { %v541_v4 = vpop.f32.mrb[4].mxu1 }
 0x40a   :  { %v966_v5 = vpop.f32.mrb[5].mxu1  ;;  %v553_v27 = vadd.f32 %v844_v26, %v541_v4 }
 0x40b   :  { %v544_v6 = vpop.f32.mrb[6].mxu1 }
 0x40c   :  { %v967_v7 = vpop.f32.mrb[7].mxu1 }
 0x411   :  { %v668_v9 = vpop.f32.mrb[12].mxu0 }
 0x412   :  { %v669_v10 = vadd.f32 %v847_v8, %v668_v9  ;;  %v980_v11 = vpop.f32.mrb[13].mxu0 }
 0x413   :  { %v671_v12 = vpop.f32.mrb[14].mxu0 }
 0x414   :  { %v674_v13 = vmax.f32 %v669_v10, 0.0  ;;  %v981_v14 = vpop.f32.mrb[15].mxu0 }
 0x416   :  { %v675_v16 = vpack.c.bf16 %v674_v13, %v674_v13 }
 0x418   :  { %987 = vmatmul.mubr.msk.bf16.vlgmr.msra.gmra.mrb[16].mxu0 %vm630_vm3, %v675_v16 }
 0x419   :  { %991 = vmatpush3.bf16.msra.mxu0 %v1043_v15  ;;  %994 = vmatprep.mubr.msk.bf16.mxu0 %vm1267_vm0, %v1266_v0 }
 0x41a   :  { %992 = vmatprep.subr.bf16.mxu0 %v1266_v0 }
 0x41d   :  { %993 = vmatpush3.bf16.msra.mxu0 %v1044_v17 }
 0x4eb   :  { %v738_v19 = vpop.f32.mrb[16].mxu0 }
 0x4ec   :  { %v739_v20 = vadd.f32 %v855_v18, %v738_v19  ;;  %v988_v21 = vpop.f32.mrb[17].mxu0 }
 0x4ed   :  { %v741_v22 = vpop.f32.mrb[18].mxu0 }
 0x4ee   :  { %v744_v23 = vmax.f32 %v739_v20, 0.0  ;;  %v989_v24 = vpop.f32.mrb[19].mxu0 }
 0x4f0   :  { %v745_v25 = vpack.c.bf16 %v744_v23, %v744_v23 }
 0x4f2   :  { %995 = vmatmul.mubr.msk.bf16.vlgmr.msra.gmra.mrb[20].mxu0 %vm630_vm3, %v745_v25 }
 0x5c5   :  { %v799_v28 = vpop.f32.mrb[20].mxu0 }
 0x5c6   :  { %v805_v29 = vadd.f32 %v799_v28, %v553_v27  ;;  %v996_v0 = vpop.f32.mrb[21].mxu0 }
 0x5c7   :  { %v802_v30 = vpop.f32.mrb[22].mxu0 }
 0x5c8   :  { %806 = vst [vmem:[%s1563_s12] sm:$0xff] %v805_v29  ;;  %v997_v31 = vpop.f32.mrb[23].mxu0 }
 0x5c9   :  { %811 = vsyncpa [#allocation3], 1 }
 0x5ca   :  { %812 = vsyncpa [#allocation5], 1 }
 0x5cb   :  { %813 = vsyncpa [#allocation8], 1 }
 0x5cc   :  { %814 = vsyncpa [#allocation11], 1 }
 0x5cd   :  { %815 = vsyncpa [#allocation14], 1 }

</bundles_post_ra>
